<compile_context>
chip_gen: v6e
topology: v6e:2x2x1
jax: 0.10.0
libtpu: 0.0.40
codegen_flags: <defaults>
</compile_context>

<pallas_src>
import functools

import jax
import jax.numpy as jnp
from jax.experimental import pallas as pl
from jax.experimental.pallas import tpu as pltpu


def _round_up(x, m):
    return (x + m - 1) // m * m


def _conv_bn_leaky_kernel(w_ref, b_ref, x_ref, o_ref, *, kh, kw, stride,
                          c_in, w2, l_pad, neg_slope):
    """One (image, c_out-tile) block.

    w_ref: (kh*kw, co_blk, c_in)   bf16  per-tap conv weights (BN scale folded)
    b_ref: (co_blk, 1)             f32   folded BN bias
    x_ref: (s*s*c_in, x_len)       bf16  phase-plane image, spatially flattened
    o_ref: (co_blk, l_pad)               lane-dense output tile
    """
    co_blk = o_ref.shape[0]
    acc = jnp.zeros((co_blk, l_pad), jnp.float32)
    # kh*kw small static taps: each is a contiguous flat window of the image
    # (garbage columns included) and one MXU dot accumulated in f32.
    for t in range(kh * kw):
        ih, iw = t // kw, t % kw
        ph, pw = ih % stride, iw % stride            # stride phase
        oh0, ow0 = ih // stride, iw // stride        # offset inside the phase plane
        p0 = (ph * stride + pw) * c_in               # channel-plane slab start
        off = oh0 * w2 + ow0                         # flat spatial offset
        slab = x_ref[pl.ds(p0, c_in), pl.ds(off, l_pad)]          # (c_in, l_pad)
        acc = acc + jnp.dot(w_ref[t], slab,
                            preferred_element_type=jnp.float32)
    y = acc + b_ref[...]                                          # BN bias
    o_ref[...] = jnp.where(y > 0, y, neg_slope * y).astype(o_ref.dtype)


def _conv_bn_leaky_impl(x_nchw, weight_oihw, gamma, beta, running_mean,
                        running_var, *, stride, padding, eps, groups):
    assert groups == 1  # TODO(synk): grouped conv not implemented (default is 1)
    n, c_in, h, w = x_nchw.shape
    c_out, c_in_w, kh, kw = weight_oihw.shape
    assert c_in_w == c_in
    s = stride

    h_p, w_p = h + 2 * padding, w + 2 * padding
    h_out = (h_p - kh) // s + 1
    w_out = (w_p - kw) // s + 1

    # ---- Fold BN (inference / running-stats semantics) into the conv weights ----
    inv_std = gamma / jnp.sqrt(running_var + eps)                  # (c_out,)
    bias = (beta - running_mean * inv_std).astype(jnp.float32)     # (c_out,)
    w_folded = weight_oihw * inv_std[:, None, None, None]          # (c_out,c_in,kh,kw)

    # ---- One cheap input pass: pad + (for stride>1) space-to-depth + flatten ----
    h_pp, w_pp = _round_up(h_p, s), _round_up(w_p, s)
    h2, w2 = h_pp // s, w_pp // s
    x_bf = x_nchw.astype(jnp.bfloat16)
    x_pad = jnp.pad(x_bf, ((0, 0), (0, 0),
                           (padding, h_pp - h - padding),
                           (padding, w_pp - w - padding)))
    if s == 1:
        x_planes = x_pad.reshape(n, c_in, h2 * w2)
    else:
        # plane index = (ph*s + pw)*c_in + ci ; flat index = r*w2 + c
        x_planes = (x_pad.reshape(n, c_in, h2, s, w2, s)
                    .transpose(0, 3, 5, 1, 2, 4)
                    .reshape(n, s * s * c_in, h2 * w2))
    c_planes = s * s * c_in

    # ---- Flat-output geometry (garbage columns where ow >= w_out) ----
    l_out = h_out * w2                       # valid rows, padded width
    l_pad = _round_up(l_out, 128)            # lane-dense output width
    max_off = ((kh - 1) // s) * w2 + (kw - 1) // s
    x_len = _round_up(max_off + l_pad, 128)
    x_planes = jnp.pad(x_planes, ((0, 0), (0, 0), (0, x_len - h2 * w2)))

    # ---- c_out tiling from a VMEM budget (keeps v7x's 64 MiB happy) ----
    c_out_pad8 = _round_up(c_out, 8)
    out_itemsize = jnp.dtype(x_nchw.dtype).itemsize
    per_co_bytes = (l_pad * (2 * out_itemsize + 4)          # out dbl-buf + f32 acc
                    + kh * kw * 128 * 2 * 2 + 2048)          # weights + bias
    in_bytes = 2 * c_planes * x_len * 2                      # input dbl-buf (bf16)
    budget = 24 << 20
    co_budget = max(budget - in_bytes, 8 * per_co_bytes)
    co_blk = min(c_out_pad8, max(8, (co_budget // per_co_bytes) // 8 * 8))
    # v7x has 2 TensorCores: make sure there are >= 2 parallel grid steps.
    if n == 1 and co_blk >= c_out_pad8 and c_out_pad8 >= 16:
        co_blk = _round_up(c_out_pad8 // 2, 8)
    c_out_pad = _round_up(c_out_pad8, co_blk)
    n_co = c_out_pad // co_blk

    # ---- Weights / bias in per-tap layout ----
    w_taps = jnp.transpose(w_folded, (2, 3, 0, 1)).reshape(kh * kw, c_out, c_in)
    w_taps = jnp.pad(w_taps, ((0, 0), (0, c_out_pad - c_out), (0, 0))
                     ).astype(jnp.bfloat16)
    bias2d = jnp.pad(bias, (0, c_out_pad - c_out)).reshape(c_out_pad, 1)

    # ---- VMEM limit derived from the actual buffer sizes ----
    est = (in_bytes
           + 2 * co_blk * l_pad * out_itemsize                 # output double buffer
           + co_blk * l_pad * 4                                # f32 accumulator
           + 2 * kh * kw * _round_up(co_blk, 16) * 128 * 2     # weights
           + 2 * _round_up(co_blk, 8) * 128 * 4)               # bias
    vmem_limit = int(min(max(est + (8 << 20), 32 << 20), 64 << 20))

    kernel = functools.partial(_conv_bn_leaky_kernel, kh=kh, kw=kw, stride=s,
                               c_in=c_in, w2=w2, l_pad=l_pad, neg_slope=0.1)

    out_flat = pl.pallas_call(
        kernel,
        out_shape=jax.ShapeDtypeStruct((n, c_out_pad, l_pad), x_nchw.dtype),
        grid_spec=pltpu.PrefetchScalarGridSpec(
            num_scalar_prefetch=0,
            grid=(n, n_co),
            in_specs=[
                pl.BlockSpec((kh * kw, co_blk, c_in), lambda b, co: (0, co, 0)),
                pl.BlockSpec((co_blk, 1), lambda b, co: (co, 0)),
                # Whole image resident; constant index across the inner c_out
                # axis, so it is fetched from HBM once per image.
                pl.BlockSpec((None, c_planes, x_len), lambda b, co: (b, 0, 0)),
            ],
            out_specs=pl.BlockSpec((None, co_blk, l_pad),
                                   lambda b, co: (b, co, 0)),
        ),
        compiler_params=pltpu.CompilerParams(
            dimension_semantics=("parallel", "parallel"),
            vmem_limit_bytes=vmem_limit),
    )(w_taps, bias2d, x_planes)

    # Strip channel padding and the garbage (padded-width) columns.
    out = out_flat[:, :c_out, :h_out * w2].reshape(n, c_out, h_out, w2)
    return out[:, :, :, :w_out]


@functools.partial(jax.jit, static_argnames=("stride", "padding", "eps", "groups"))
def conv_bn_leaky(x_nchw, weight_oihw, gamma, beta, running_mean, running_var,
                  *, stride=1, padding=0, eps=1e-5, groups=1):
    """ConvBNLayer.forward (act='leaky', groups=1, BatchNorm in inference mode)."""
    return _conv_bn_leaky_impl(x_nchw, weight_oihw, gamma, beta, running_mean,
                               running_var, stride=stride, padding=padding,
                               eps=eps, groups=groups)


def _reference(x_nchw, weight_oihw, gamma, beta, mean, var, *, stride, padding,
               eps=1e-5):
    y = jax.lax.conv_general_dilated(
        x_nchw, weight_oihw, window_strides=(stride, stride),
        padding=[(padding, padding), (padding, padding)],
        dimension_numbers=("NCHW", "OIHW", "NCHW"))
    inv = gamma / jnp.sqrt(var + eps)
    y = y * inv[None, :, None, None] + (beta - mean * inv)[None, :, None, None]
    return jnp.where(y > 0, y, 0.1 * y)


if __name__ == "__main__":
    key = jax.random.PRNGKey(0)
    k_x, k_w, k_g, k_b, k_m, k_v = jax.random.split(key, 6)

    # ConvBNLayer(ch_in=4, ch_out=8, filter_size=3, stride=1, padding=1, act='leaky')
    N, C_IN, H, W = 2, 4, 16, 16
    C_OUT, K, STRIDE, PAD = 8, 3, 1, 1

    x = jax.random.normal(k_x, (N, C_IN, H, W), jnp.float32)
    weight = jax.random.normal(k_w, (C_OUT, C_IN, K, K), jnp.float32) * 0.1
    gamma = jax.random.normal(k_g, (C_OUT,), jnp.float32) * 0.1 + 1.0
    beta = jax.random.normal(k_b, (C_OUT,), jnp.float32) * 0.1
    running_mean = jax.random.normal(k_m, (C_OUT,), jnp.float32) * 0.1
    running_var = jax.nn.softplus(jax.random.normal(k_v, (C_OUT,), jnp.float32)) + 0.5

    out = conv_bn_leaky(x, weight, gamma, beta, running_mean, running_var,
                        stride=STRIDE, padding=PAD)
    out = jax.block_until_ready(out)
    ref = _reference(x, weight, gamma, beta, running_mean, running_var,
                     stride=STRIDE, padding=PAD)
    assert out.shape == ref.shape == (N, C_OUT, H, W)
    assert jnp.allclose(out, ref, rtol=2e-2, atol=2e-2), \
        float(jnp.max(jnp.abs(out - ref)))

    # Downsample variant (stride=2) exercising the space-to-depth phase path.
    C_OUT2, STRIDE2 = 16, 2
    weight2 = jax.random.normal(k_w, (C_OUT2, C_IN, K, K), jnp.float32) * 0.1
    g2 = jnp.ones((C_OUT2,), jnp.float32)
    b2 = jnp.zeros((C_OUT2,), jnp.float32)
    m2 = jnp.zeros((C_OUT2,), jnp.float32)
    v2 = jnp.ones((C_OUT2,), jnp.float32)
    out2 = jax.block_until_ready(
        conv_bn_leaky(x, weight2, g2, b2, m2, v2, stride=STRIDE2, padding=PAD))
    ref2 = _reference(x, weight2, g2, b2, m2, v2, stride=STRIDE2, padding=PAD)
    assert out2.shape == ref2.shape == (N, C_OUT2, H // 2, W // 2)
    assert jnp.allclose(out2, ref2, rtol=2e-2, atol=2e-2), \
        float(jnp.max(jnp.abs(out2 - ref2)))

    print("KERNEL_OK")
</pallas_src>

<mosaic_0001>
module attributes {stable_mosaic.version = 11 : i64} {
  func.func @_conv_bn_leaky_kernel(%arg0: i32, %arg1: i32, %arg2: memref<9x8x4xbf16, #tpu.memory_space<vmem>>, %arg3: memref<8x1xf32, #tpu.memory_space<vmem>>, %arg4: memref<1x4x512xbf16, #tpu.memory_space<vmem>>, %arg5: memref<1x8x384xf32, #tpu.memory_space<vmem>>) attributes {dimension_semantics = [#tpu.dimension_semantics<parallel>, #tpu.dimension_semantics<parallel>], iteration_bounds = array<i64: 2, 1>, scalar_prefetch = 0 : i64, scratch_operands = 0 : i64, tpu.core_type = #tpu.core_type<tc>, window_params = [{transform_indices = @transform_0, window_bounds = array<i64: 9, 8, 4>}, {transform_indices = @transform_1, window_bounds = array<i64: 8, 1>}, {transform_indices = @transform_2, window_bounds = array<i64: 1, 4, 512>}, {transform_indices = @transform_3, window_bounds = array<i64: 1, 8, 384>}]} {
    %cst = arith.constant 0.000000e+00 : f32
    %0 = vector.broadcast %cst : f32 to vector<8x384xf32>
    %c0 = arith.constant 0 : index
    %c0_0 = arith.constant 0 : index
    %c0_1 = arith.constant 0 : index
    %1 = vector.load %arg4[%c0, %c0_0, %c0_1] : memref<1x4x512xbf16, #tpu.memory_space<vmem>>, vector<1x4x384xbf16>
    %2 = vector.shape_cast %1 : vector<1x4x384xbf16> to vector<4x384xbf16>
    %c0_2 = arith.constant 0 : index
    %c0_3 = arith.constant 0 : index
    %c0_4 = arith.constant 0 : index
    %3 = vector.load %arg2[%c0_2, %c0_3, %c0_4] : memref<9x8x4xbf16, #tpu.memory_space<vmem>>, vector<1x8x4xbf16>
    %4 = vector.shape_cast %3 : vector<1x8x4xbf16> to vector<8x4xbf16>
    %cst_5 = arith.constant dense<0.000000e+00> : vector<8x384xf32>
    %5 = tpu.matmul %4, %2, %cst_5 {dimension_numbers = #tpu.dot_dimension_numbers<[1], [0], [0], [1], [0, 0, 1, 1], [], []>} : vector<8x4xbf16>, vector<4x384xbf16>, vector<8x384xf32> -> vector<8x384xf32>
    %6 = arith.addf %0, %5 : vector<8x384xf32>
    %c0_6 = arith.constant 0 : index
    %c0_7 = arith.constant 0 : index
    %c1 = arith.constant 1 : index
    %7 = vector.load %arg4[%c0_6, %c0_7, %c1] : memref<1x4x512xbf16, #tpu.memory_space<vmem>>, vector<1x4x384xbf16>
    %8 = vector.shape_cast %7 : vector<1x4x384xbf16> to vector<4x384xbf16>
    %c1_8 = arith.constant 1 : index
    %c0_9 = arith.constant 0 : index
    %c0_10 = arith.constant 0 : index
    %9 = vector.load %arg2[%c1_8, %c0_9, %c0_10] : memref<9x8x4xbf16, #tpu.memory_space<vmem>>, vector<1x8x4xbf16>
    %10 = vector.shape_cast %9 : vector<1x8x4xbf16> to vector<8x4xbf16>
    %cst_11 = arith.constant dense<0.000000e+00> : vector<8x384xf32>
    %11 = tpu.matmul %10, %8, %cst_11 {dimension_numbers = #tpu.dot_dimension_numbers<[1], [0], [0], [1], [0, 0, 1, 1], [], []>} : vector<8x4xbf16>, vector<4x384xbf16>, vector<8x384xf32> -> vector<8x384xf32>
    %12 = arith.addf %6, %11 : vector<8x384xf32>
    %c0_12 = arith.constant 0 : index
    %c0_13 = arith.constant 0 : index
    %c2 = arith.constant 2 : index
    %13 = vector.load %arg4[%c0_12, %c0_13, %c2] : memref<1x4x512xbf16, #tpu.memory_space<vmem>>, vector<1x4x384xbf16>
    %14 = vector.shape_cast %13 : vector<1x4x384xbf16> to vector<4x384xbf16>
    %c2_14 = arith.constant 2 : index
    %c0_15 = arith.constant 0 : index
    %c0_16 = arith.constant 0 : index
    %15 = vector.load %arg2[%c2_14, %c0_15, %c0_16] : memref<9x8x4xbf16, #tpu.memory_space<vmem>>, vector<1x8x4xbf16>
    %16 = vector.shape_cast %15 : vector<1x8x4xbf16> to vector<8x4xbf16>
    %cst_17 = arith.constant dense<0.000000e+00> : vector<8x384xf32>
    %17 = tpu.matmul %16, %14, %cst_17 {dimension_numbers = #tpu.dot_dimension_numbers<[1], [0], [0], [1], [0, 0, 1, 1], [], []>} : vector<8x4xbf16>, vector<4x384xbf16>, vector<8x384xf32> -> vector<8x384xf32>
    %18 = arith.addf %12, %17 : vector<8x384xf32>
    %c0_18 = arith.constant 0 : index
    %c0_19 = arith.constant 0 : index
    %c18 = arith.constant 18 : index
    %19 = vector.load %arg4[%c0_18, %c0_19, %c18] : memref<1x4x512xbf16, #tpu.memory_space<vmem>>, vector<1x4x384xbf16>
    %20 = vector.shape_cast %19 : vector<1x4x384xbf16> to vector<4x384xbf16>
    %c3 = arith.constant 3 : index
    %c0_20 = arith.constant 0 : index
    %c0_21 = arith.constant 0 : index
    %21 = vector.load %arg2[%c3, %c0_20, %c0_21] : memref<9x8x4xbf16, #tpu.memory_space<vmem>>, vector<1x8x4xbf16>
    %22 = vector.shape_cast %21 : vector<1x8x4xbf16> to vector<8x4xbf16>
    %cst_22 = arith.constant dense<0.000000e+00> : vector<8x384xf32>
    %23 = tpu.matmul %22, %20, %cst_22 {dimension_numbers = #tpu.dot_dimension_numbers<[1], [0], [0], [1], [0, 0, 1, 1], [], []>} : vector<8x4xbf16>, vector<4x384xbf16>, vector<8x384xf32> -> vector<8x384xf32>
    %24 = arith.addf %18, %23 : vector<8x384xf32>
    %c0_23 = arith.constant 0 : index
    %c0_24 = arith.constant 0 : index
    %c19 = arith.constant 19 : index
    %25 = vector.load %arg4[%c0_23, %c0_24, %c19] : memref<1x4x512xbf16, #tpu.memory_space<vmem>>, vector<1x4x384xbf16>
    %26 = vector.shape_cast %25 : vector<1x4x384xbf16> to vector<4x384xbf16>
    %c4 = arith.constant 4 : index
    %c0_25 = arith.constant 0 : index
    %c0_26 = arith.constant 0 : index
    %27 = vector.load %arg2[%c4, %c0_25, %c0_26] : memref<9x8x4xbf16, #tpu.memory_space<vmem>>, vector<1x8x4xbf16>
    %28 = vector.shape_cast %27 : vector<1x8x4xbf16> to vector<8x4xbf16>
    %cst_27 = arith.constant dense<0.000000e+00> : vector<8x384xf32>
    %29 = tpu.matmul %28, %26, %cst_27 {dimension_numbers = #tpu.dot_dimension_numbers<[1], [0], [0], [1], [0, 0, 1, 1], [], []>} : vector<8x4xbf16>, vector<4x384xbf16>, vector<8x384xf32> -> vector<8x384xf32>
    %30 = arith.addf %24, %29 : vector<8x384xf32>
    %c0_28 = arith.constant 0 : index
    %c0_29 = arith.constant 0 : index
    %c20 = arith.constant 20 : index
    %31 = vector.load %arg4[%c0_28, %c0_29, %c20] : memref<1x4x512xbf16, #tpu.memory_space<vmem>>, vector<1x4x384xbf16>
    %32 = vector.shape_cast %31 : vector<1x4x384xbf16> to vector<4x384xbf16>
    %c5 = arith.constant 5 : index
    %c0_30 = arith.constant 0 : index
    %c0_31 = arith.constant 0 : index
    %33 = vector.load %arg2[%c5, %c0_30, %c0_31] : memref<9x8x4xbf16, #tpu.memory_space<vmem>>, vector<1x8x4xbf16>
    %34 = vector.shape_cast %33 : vector<1x8x4xbf16> to vector<8x4xbf16>
    %cst_32 = arith.constant dense<0.000000e+00> : vector<8x384xf32>
    %35 = tpu.matmul %34, %32, %cst_32 {dimension_numbers = #tpu.dot_dimension_numbers<[1], [0], [0], [1], [0, 0, 1, 1], [], []>} : vector<8x4xbf16>, vector<4x384xbf16>, vector<8x384xf32> -> vector<8x384xf32>
    %36 = arith.addf %30, %35 : vector<8x384xf32>
    %c0_33 = arith.constant 0 : index
    %c0_34 = arith.constant 0 : index
    %c36 = arith.constant 36 : index
    %37 = vector.load %arg4[%c0_33, %c0_34, %c36] : memref<1x4x512xbf16, #tpu.memory_space<vmem>>, vector<1x4x384xbf16>
    %38 = vector.shape_cast %37 : vector<1x4x384xbf16> to vector<4x384xbf16>
    %c6 = arith.constant 6 : index
    %c0_35 = arith.constant 0 : index
    %c0_36 = arith.constant 0 : index
    %39 = vector.load %arg2[%c6, %c0_35, %c0_36] : memref<9x8x4xbf16, #tpu.memory_space<vmem>>, vector<1x8x4xbf16>
    %40 = vector.shape_cast %39 : vector<1x8x4xbf16> to vector<8x4xbf16>
    %cst_37 = arith.constant dense<0.000000e+00> : vector<8x384xf32>
    %41 = tpu.matmul %40, %38, %cst_37 {dimension_numbers = #tpu.dot_dimension_numbers<[1], [0], [0], [1], [0, 0, 1, 1], [], []>} : vector<8x4xbf16>, vector<4x384xbf16>, vector<8x384xf32> -> vector<8x384xf32>
    %42 = arith.addf %36, %41 : vector<8x384xf32>
    %c0_38 = arith.constant 0 : index
    %c0_39 = arith.constant 0 : index
    %c37 = arith.constant 37 : index
    %43 = vector.load %arg4[%c0_38, %c0_39, %c37] : memref<1x4x512xbf16, #tpu.memory_space<vmem>>, vector<1x4x384xbf16>
    %44 = vector.shape_cast %43 : vector<1x4x384xbf16> to vector<4x384xbf16>
    %c7 = arith.constant 7 : index
    %c0_40 = arith.constant 0 : index
    %c0_41 = arith.constant 0 : index
    %45 = vector.load %arg2[%c7, %c0_40, %c0_41] : memref<9x8x4xbf16, #tpu.memory_space<vmem>>, vector<1x8x4xbf16>
    %46 = vector.shape_cast %45 : vector<1x8x4xbf16> to vector<8x4xbf16>
    %cst_42 = arith.constant dense<0.000000e+00> : vector<8x384xf32>
    %47 = tpu.matmul %46, %44, %cst_42 {dimension_numbers = #tpu.dot_dimension_numbers<[1], [0], [0], [1], [0, 0, 1, 1], [], []>} : vector<8x4xbf16>, vector<4x384xbf16>, vector<8x384xf32> -> vector<8x384xf32>
    %48 = arith.addf %42, %47 : vector<8x384xf32>
    %c0_43 = arith.constant 0 : index
    %c0_44 = arith.constant 0 : index
    %c38 = arith.constant 38 : index
    %49 = vector.load %arg4[%c0_43, %c0_44, %c38] : memref<1x4x512xbf16, #tpu.memory_space<vmem>>, vector<1x4x384xbf16>
    %50 = vector.shape_cast %49 : vector<1x4x384xbf16> to vector<4x384xbf16>
    %c8 = arith.constant 8 : index
    %c0_45 = arith.constant 0 : index
    %c0_46 = arith.constant 0 : index
    %51 = vector.load %arg2[%c8, %c0_45, %c0_46] : memref<9x8x4xbf16, #tpu.memory_space<vmem>>, vector<1x8x4xbf16>
    %52 = vector.shape_cast %51 : vector<1x8x4xbf16> to vector<8x4xbf16>
    %cst_47 = arith.constant dense<0.000000e+00> : vector<8x384xf32>
    %53 = tpu.matmul %52, %50, %cst_47 {dimension_numbers = #tpu.dot_dimension_numbers<[1], [0], [0], [1], [0, 0, 1, 1], [], []>} : vector<8x4xbf16>, vector<4x384xbf16>, vector<8x384xf32> -> vector<8x384xf32>
    %54 = arith.addf %48, %53 : vector<8x384xf32>
    %c0_48 = arith.constant 0 : index
    %c0_49 = arith.constant 0 : index
    %55 = vector.load %arg3[%c0_48, %c0_49] : memref<8x1xf32, #tpu.memory_space<vmem>>, vector<8x1xf32>
    %56 = vector.broadcast %55 : vector<8x1xf32> to vector<8x384xf32>
    %57 = arith.addf %54, %56 : vector<8x384xf32>
    %cst_50 = arith.constant 0.000000e+00 : f32
    %58 = vector.broadcast %cst_50 : f32 to vector<8x384xf32>
    %59 = arith.cmpf ogt, %57, %58 : vector<8x384xf32>
    %cst_51 = arith.constant 1.000000e-01 : f32
    %60 = vector.broadcast %cst_51 : f32 to vector<8x384xf32>
    %61 = arith.mulf %60, %57 : vector<8x384xf32>
    %62 = arith.select %59, %57, %61 : vector<8x384xi1>, vector<8x384xf32>
    %c0_52 = arith.constant 0 : index
    %c0_53 = arith.constant 0 : index
    %c0_54 = arith.constant 0 : index
    %63 = vector.load %arg5[%c0_52, %c0_53, %c0_54] : memref<1x8x384xf32, #tpu.memory_space<vmem>>, vector<1x8x384xf32>
    %64 = vector.shape_cast %63 : vector<1x8x384xf32> to vector<8x384xf32>
    %65 = vector.shape_cast %62 : vector<8x384xf32> to vector<1x8x384xf32>
    tpu.vector_store %arg5[%c0_52, %c0_53, %c0_54], %65 {strides = array<i32>} : memref<1x8x384xf32, #tpu.memory_space<vmem>>, vector<1x8x384xf32>,
    return
  }
  func.func @transform_0(%arg0: i32, %arg1: i32) -> (i32, i32, i32) {
    %c0_i32 = arith.constant 0 : i32
    %c0_i32_0 = arith.constant 0 : i32
    %c0_i32_1 = arith.constant 0 : i32
    return %c0_i32, %arg1, %c0_i32_0 : i32, i32, i32
  }
  func.func @transform_1(%arg0: i32, %arg1: i32) -> (i32, i32) {
    %c0_i32 = arith.constant 0 : i32
    %c0_i32_0 = arith.constant 0 : i32
    return %arg1, %c0_i32 : i32, i32
  }
  func.func @transform_2(%arg0: i32, %arg1: i32) -> (i32, i32, i32) {
    %c0_i32 = arith.constant 0 : i32
    %c0_i32_0 = arith.constant 0 : i32
    %c0_i32_1 = arith.constant 0 : i32
    return %arg0, %c0_i32, %c0_i32_0 : i32, i32, i32
  }
  func.func @transform_3(%arg0: i32, %arg1: i32) -> (i32, i32, i32) {
    %c0_i32 = arith.constant 0 : i32
    %c0_i32_0 = arith.constant 0 : i32
    return %arg0, %arg1, %c0_i32 : i32, i32, i32
  }
}

</mosaic_0001>

<bundles_post_ra>
// kernel: conv_bn_leaky.1
= control target key start
LH: loop header
LB: loop body
LE: loop exit
PB: predicated region body
PF: predicated region fallthrough
CT: control target
= control target key end

     0   :  { %s1722_s12 = smov 0   ;;  %s1724_s13 = smov 0   ;;  %s1879_s0 = inlined_call_operand.vmem [shape: bf16[9,8,4], index: 0, kind: input, shape index: {}]   ;;  %s1880_s1 = inlined_call_operand.vmem [shape: f32[8,1], index: 1, kind: input, shape index: {}]   ;;  %s1881_s2 = inlined_call_operand.vmem [shape: bf16[2,4,512], index: 2, kind: input, shape index: {}]   ;;  %s1882_s3 = inlined_call_operand.vmem [shape: f32[2,8,384], index: 3, kind: output, shape index: {}]  }
   0x1   :  { %s1726_s14 = smov 0  }
   0x2 LB: > { %s25_s15 = sadd.s32 1, %s1684_s13  ;;  %p1512_p0 = scmp.ge.s32.totalorder %s1688_s14, 1  ;;  %s1688_s14 = sphi %s1726_s14, %s13_s14   ;;  %s1684_s13 = sphi %s1724_s13, %s1884_s13   ;;  %s1680_s12 = sphi %s1722_s12, %s1883_s12  }
   0x3   : > { %p27_p1 = scmp.ge.s32.totalorder %s25_s15, 2  ;;  %p169_p2 = scmp.lt.s32.totalorder %s1688_s14, 3 }
   0x5   : > { %s1886_s15 = smov (%p27_p1, %s25_s15), 0  ;;  %p170_p3 = pnand %p1512_p0, %p169_p2 }
   0x6   : > { %p213_p4 = scmp.lt.s32.totalorder (!%p170_p3), %s1680_s12, 1  ;;  %s1694_s20 = smov (!%p170_p3), 127  }
   0x7   : > { %173 = sbr.rel (%p170_p3) target bundleno = 412 (0x19c), region = 32  ;;  %s1695_s21 = smov (!%p170_p3), 126  }
   0x8   : > { %s1696_s22 = smov (!%p170_p3), 110   ;;  %s1697_s23 = smov (!%p170_p3), 109  }
   0x9   : > { %s1698_s24 = smov (!%p170_p3), 108   ;;  %s1699_s25 = smov (!%p170_p3), 92  }
   0xa   : > { %s1700_s26 = smov (!%p170_p3), 91   ;;  %s1701_s27 = smov (!%p170_p3), 90  }
   0xc   : > { %v238_v0 = vlaneseq  ;;  %v1690_v1 = vmov 1983009808   ;;  %s1888_s12 = smov (!%p213_p4, %s1680_s12), 1  ;;  %v1691_v5 = vmov 0.0   ;;  %v1692_v6 = vmov 0   ;;  %v1371_v18 = vld [vmem:[%s1880_s1] sm:$0xff] }
   0xd   : > { %v236_v2 = vunpack.c.l.s4 %v1690_v1  ;;  %1572 = vmatprep.subr.bf16.mxu1 %v1691_v5  ;;  %309 = vmatprep.mubr.bf16.mxu0 %v1692_v6  ;;  %s1553_s16 = sshll.u32 %s1888_s12, 3  ;;  %vm1693_vm0 = vmmov 0   ;;  %vm259_vm1 = vcmask 1039360   ;;  %vm267_vm2 = vcmask 1041408   ;;  %v1516_v28 = vld [vmem:[%s1879_s0 + $0x4] sm:$0xf] }
   0xe   : > { %v239_v3 = vshrl.u32 %v238_v0, 7  ;;  %1663 = vset.pattern.permute.xlu0 %v1692_v6  ;;  %s217_s19 = scalar_lea.vmem %s1881_s2, %s1553_s16  ;;  %1574 = vmatprep.mubr.msk.bf16.mxu1 %vm1693_vm0, %v1691_v5  ;;  %vm263_vm3 = vcmask 31744   ;;  %vm497_vm4 = vcmask 1031168   ;;  %v229_v39 = vld [vmem:[%s1879_s0] sm:$0xf]  ;;  %vm626_vm5 = vcmask 900096  }
   0xf   : > { %v237_v4 = vunpack.c.0.s8 %v236_v2  ;;  %v230_v8 = vld [vmem:[%s217_s19] sm:$0xff]  ;;  %v1523_v49 = vld [vmem:[%s1879_s0 + $0x8] sm:$0xf]  ;;  %vm755_vm6 = vcmask 891904   ;;  %v1527_v59 = vld [vmem:[%s1879_s0 + $0xc] sm:$0xf] }
  0x10   : > { %v228_v9 = vld [vmem:[%s217_s19] sm:$0x3f]  ;;  %v234_v11 = vcombine.high %v230_v8, %v230_v8  ;;  %vm884_vm7 = vcmask 883712   ;;  %vm1013_vm8 = vcmask 752640   ;;  %vm1142_vm9 = vcmask 744448  }
  0x11   : > { %v240_v7 = vsub.s32 %v237_v4, %v239_v3  ;;  %v359_v13 = vcombine.high %v228_v9, %v228_v9  ;;  %vm1271_vm10 = vcmask 736256  }
  0x13   : > { %v241_v10 = vrot.slane %v230_v8, %v240_v7  ;;  %v1751_v12 = vrot.slane %v228_v9, %v240_v7  ;;  %v248_v15 = vrot.slane %v234_v11, %v240_v7  ;;  %v1753_v16 = vrot.slane %v359_v13, %v240_v7  ;;  %v1531_v7 = vld [vmem:[%s1879_s0 + $0x10] sm:$0xf] }
  0x15   : > { %251 = vrot.lane.b32.xlu0 %v241_v10, %s1694_s20  ;;  %v249_v14 = vcombine.high %v241_v10, %v241_v10  ;;  %255 = vrot.lane.b32.xlu1 %v248_v15, %s1694_s20  ;;  %v250_v17 = vcombine.high %v248_v15, %v248_v15  ;;  %v374_v22 = vcombine.high %v1751_v12, %v1751_v12  ;;  %v379_v31 = vsel %vm267_vm2, %v1751_v12, 0 }
  0x16   : > { %v385_v33 = vsel %vm267_vm2, %v1753_v16, 0 }
  0x19   : > { %253 = vrot.lane.b32.xlu0 %v249_v14, %s1694_s20  ;;  %257 = vrot.lane.b32.xlu1 %v250_v17, %s1694_s20 }
  0x1d   : > { %489 = vrot.lane.b32.xlu0 %v241_v10, %s1695_s21  ;;  %491 = vrot.lane.b32.xlu1 %v249_v14, %s1695_s21 }
  0x21   : > { %493 = vrot.lane.b32.xlu0 %v248_v15, %s1695_s21  ;;  %495 = vrot.lane.b32.xlu1 %v250_v17, %s1695_s21 }
  0x25   : > { %618 = vrot.lane.b32.xlu0 %v241_v10, %s1696_s22  ;;  %620 = vrot.lane.b32.xlu1 %v249_v14, %s1696_s22 }
  0x29   : > { %622 = vrot.lane.b32.xlu0 %v248_v15, %s1696_s22  ;;  %624 = vrot.lane.b32.xlu1 %v250_v17, %s1696_s22 }
  0x2d   : > { %747 = vrot.lane.b32.xlu0 %v241_v10, %s1697_s23  ;;  %749 = vrot.lane.b32.xlu1 %v249_v14, %s1697_s23 }
  0x31   : > { %751 = vrot.lane.b32.xlu0 %v248_v15, %s1697_s23  ;;  %753 = vrot.lane.b32.xlu1 %v250_v17, %s1697_s23 }
  0x35   : > { %876 = vrot.lane.b32.xlu0 %v241_v10, %s1698_s24  ;;  %878 = vrot.lane.b32.xlu1 %v249_v14, %s1698_s24 }
  0x39   : > { %880 = vrot.lane.b32.xlu0 %v248_v15, %s1698_s24  ;;  %882 = vrot.lane.b32.xlu1 %v250_v17, %s1698_s24 }
  0x3d   : > { %1005 = vrot.lane.b32.xlu0 %v241_v10, %s1699_s25  ;;  %1007 = vrot.lane.b32.xlu1 %v249_v14, %s1699_s25 }
  0x41   : > { %1009 = vrot.lane.b32.xlu0 %v248_v15, %s1699_s25  ;;  %1011 = vrot.lane.b32.xlu1 %v250_v17, %s1699_s25  ;;  %s1626_s25 = smul.u32 24, %s1888_s12 }
  0x43   : > { %s226_s28 = scalar_lea.vmem %s1882_s3, %s1626_s25 }
  0x45   : > { %1134 = vrot.lane.b32.xlu0 %v241_v10, %s1700_s26  ;;  %1136 = vrot.lane.b32.xlu1 %v249_v14, %s1700_s26 }
  0x49   : > { %1138 = vrot.lane.b32.xlu0 %v248_v15, %s1700_s26  ;;  %1140 = vrot.lane.b32.xlu1 %v250_v17, %s1700_s26 }
  0x4d   : > { %1263 = vrot.lane.b32.xlu0 %v241_v10, %s1701_s27  ;;  %1265 = vrot.lane.b32.xlu1 %v249_v14, %s1701_s27 }
  0x51   : > { %1267 = vrot.lane.b32.xlu0 %v248_v15, %s1701_s27  ;;  %1269 = vrot.lane.b32.xlu1 %v250_v17, %s1701_s27  ;;  %v1535_v17 = vld [vmem:[%s1879_s0 + $0x14] sm:$0xf] }
  0x55   : > { %1374 = vperm.xlu0 %1663, %v1371_v18  }
  0x87   : > { %v252_v19 = vpop.permute.xlu0 %251  ;;  %v256_v20 = vpop.permute.xlu1 %255 }
  0x8b   : > { %v254_v21 = vpop.permute.xlu0 %253  ;;  %v258_v25 = vpop.permute.xlu1 %257 }
  0x8c   : > { %v261_v23 = vsel %vm259_vm1, %v254_v21, %v256_v20  ;;  %v260_v24 = vsel %vm259_vm1, %v252_v19, %v254_v21  ;;  %v262_v27 = vsel %vm259_vm1, %v256_v20, %v258_v25 }
  0x8d   : > { %1517 = vmatprep.subr.msk.bf16.mxu0 %vm267_vm2, %v261_v23  ;;  %v269_v26 = vsel %vm267_vm2, %v260_v24, 0  ;;  %v275_v29 = vsel %vm267_vm2, %v262_v27, 0  ;;  %v1539_v27 = vld [vmem:[%s1879_s0 + $0x18] sm:$0xf] }
  0x8e   : > { %292 = vmatpush1.bf16.msra.mxu0 %v269_v26  ;;  %1573 = vmatpush3.bf16.msra.mxu1 %v275_v29 }
  0x8f   : > { %v490_v30 = vpop.permute.xlu0 %489  ;;  %1520 = vmatprep.subr.msk.bf16.mxu0 %vm267_vm2, %v374_v22  ;;  %1578 = vmatprep.subr.bf16.mxu1 %v1691_v5  ;;  %v492_v32 = vpop.permute.xlu1 %491 }
  0x90   : > { %v498_v35 = vsel %vm497_vm4, %v490_v30, %v492_v32 }
  0x91   : > { %1518 = vmatmul.mubr.msk.bf16.vlgmr.msra.gmra.mxu0 %vm263_vm3, %v1516_v28  ;;  %1575 = vmatmul.mubr.msk.bf16.vlgmr.msra.gmra.mxu1 %vm263_vm3, %v1516_v28  ;;  %v505_v40 = vsel %vm267_vm2, %v498_v35, 0 }
  0x92   : > { %402 = vmatpush1.bf16.msra.mxu0 %v379_v31  ;;  %419 = vmatprep.mubr.bf16.mxu0 %v1692_v6 }
  0x93   : > { %v494_v34 = vpop.permute.xlu0 %493  ;;  %1579 = vmatpush3.bf16.msra.mxu1 %v385_v33  ;;  %1580 = vmatprep.mubr.msk.bf16.mxu1 %vm1693_vm0, %v1691_v5  ;;  %v496_v37 = vpop.permute.xlu1 %495 }
  0x94   : > { %v499_v36 = vsel %vm497_vm4, %v492_v32, %v494_v34  ;;  %1584 = vmatprep.subr.bf16.mxu1 %v1691_v5  ;;  %v500_v38 = vsel %vm497_vm4, %v494_v34, %v496_v37  ;;  %v1543_v37 = vld [vmem:[%s1879_s0 + $0x1c] sm:$0xf] }
  0x95   : > { %1524 = vmatprep.subr.msk.bf16.mxu0 %vm267_vm2, %v499_v36  ;;  %v511_v42 = vsel %vm267_vm2, %v500_v38, 0 }
  0x97   : > { %v619_v41 = vpop.permute.xlu0 %618  ;;  %v621_v43 = vpop.permute.xlu1 %620 }
  0x98   : > { %v627_v45 = vsel %vm626_vm5, %v619_v41, %v621_v43 }
  0x99   : > { %1521 = vmatmul.mubr.msk.bf16.vlgmr.msra.gmra.mxu0 %vm263_vm3, %v229_v39  ;;  %1581 = vmatmul.mubr.msk.bf16.vlgmr.msra.gmra.mxu1 %vm263_vm3, %v229_v39  ;;  %v634_v50 = vsel %vm267_vm2, %v627_v45, 0 }
  0x9a   : > { %528 = vmatpush1.bf16.msra.mxu0 %v505_v40  ;;  %545 = vmatprep.mubr.bf16.mxu0 %v1692_v6  ;;  %v1547_v40 = vld [vmem:[%s1879_s0 + $0x20] sm:$0xf] }
  0x9b   : > { %v623_v44 = vpop.permute.xlu0 %622  ;;  %1585 = vmatpush3.bf16.msra.mxu1 %v511_v42  ;;  %1586 = vmatprep.mubr.msk.bf16.mxu1 %vm1693_vm0, %v1691_v5  ;;  %v625_v47 = vpop.permute.xlu1 %624 }
  0x9c   : > { %v628_v46 = vsel %vm626_vm5, %v621_v43, %v623_v44  ;;  %1590 = vmatprep.subr.bf16.mxu1 %v1691_v5  ;;  %v629_v48 = vsel %vm626_vm5, %v623_v44, %v625_v47 }
  0x9d   : > { %1528 = vmatprep.subr.msk.bf16.mxu0 %vm267_vm2, %v628_v46  ;;  %v640_v52 = vsel %vm267_vm2, %v629_v48, 0 }
  0x9f   : > { %v748_v51 = vpop.permute.xlu0 %747  ;;  %v750_v53 = vpop.permute.xlu1 %749 }
  0xa0   : > { %v756_v55 = vsel %vm755_vm6, %v748_v51, %v750_v53 }
  0xa1   : > { %1525 = vmatmul.mubr.msk.bf16.vlgmr.msra.gmra.mxu0 %vm263_vm3, %v1523_v49  ;;  %1587 = vmatmul.mubr.msk.bf16.vlgmr.msra.gmra.mxu1 %vm263_vm3, %v1523_v49  ;;  %v763_v60 = vsel %vm267_vm2, %v756_v55, 0 }
  0xa2   : > { %657 = vmatpush1.bf16.msra.mxu0 %v634_v50  ;;  %674 = vmatprep.mubr.bf16.mxu0 %v1692_v6 }
  0xa3   : > { %v752_v54 = vpop.permute.xlu0 %751  ;;  %1591 = vmatpush3.bf16.msra.mxu1 %v640_v52  ;;  %1592 = vmatprep.mubr.msk.bf16.mxu1 %vm1693_vm0, %v1691_v5  ;;  %v754_v57 = vpop.permute.xlu1 %753 }
  0xa4   : > { %v757_v56 = vsel %vm755_vm6, %v750_v53, %v752_v54  ;;  %1596 = vmatprep.subr.bf16.mxu1 %v1691_v5  ;;  %v758_v58 = vsel %vm755_vm6, %v752_v54, %v754_v57 }
  0xa5   : > { %1532 = vmatprep.subr.msk.bf16.mxu0 %vm267_vm2, %v757_v56  ;;  %v769_v62 = vsel %vm267_vm2, %v758_v58, 0 }
  0xa7   : > { %v877_v61 = vpop.permute.xlu0 %876  ;;  %v879_v63 = vpop.permute.xlu1 %878 }
  0xa8   : > { %v885_v1 = vsel %vm884_vm7, %v877_v61, %v879_v63 }
  0xa9   : > { %1529 = vmatmul.mubr.msk.bf16.vlgmr.msra.gmra.mxu0 %vm263_vm3, %v1527_v59  ;;  %1593 = vmatmul.mubr.msk.bf16.vlgmr.msra.gmra.mxu1 %vm263_vm3, %v1527_v59  ;;  %v892_v8 = vsel %vm267_vm2, %v885_v1, 0 }
  0xaa   : > { %786 = vmatpush1.bf16.msra.mxu0 %v763_v60  ;;  %803 = vmatprep.mubr.bf16.mxu0 %v1692_v6 }
  0xab   : > { %v881_v0 = vpop.permute.xlu0 %880  ;;  %1597 = vmatpush3.bf16.msra.mxu1 %v769_v62  ;;  %1598 = vmatprep.mubr.msk.bf16.mxu1 %vm1693_vm0, %v1691_v5  ;;  %v883_v3 = vpop.permute.xlu1 %882 }
  0xac   : > { %v886_v2 = vsel %vm884_vm7, %v879_v63, %v881_v0  ;;  %1602 = vmatprep.subr.bf16.mxu1 %v1691_v5  ;;  %v887_v4 = vsel %vm884_vm7, %v881_v0, %v883_v3 }
  0xad   : > { %1536 = vmatprep.subr.msk.bf16.mxu0 %vm267_vm2, %v886_v2  ;;  %v898_v10 = vsel %vm267_vm2, %v887_v4, 0 }
  0xaf   : > { %v1006_v9 = vpop.permute.xlu0 %1005  ;;  %v1008_v11 = vpop.permute.xlu1 %1007 }
  0xb0   : > { %v1014_v13 = vsel %vm1013_vm8, %v1006_v9, %v1008_v11 }
  0xb1   : > { %1533 = vmatmul.mubr.msk.bf16.vlgmr.msra.gmra.mxu0 %vm263_vm3, %v1531_v7  ;;  %1599 = vmatmul.mubr.msk.bf16.vlgmr.msra.gmra.mxu1 %vm263_vm3, %v1531_v7  ;;  %v1021_v18 = vsel %vm267_vm2, %v1014_v13, 0 }
  0xb2   : > { %915 = vmatpush1.bf16.msra.mxu0 %v892_v8  ;;  %932 = vmatprep.mubr.bf16.mxu0 %v1692_v6 }
  0xb3   : > { %v1010_v12 = vpop.permute.xlu0 %1009  ;;  %1603 = vmatpush3.bf16.msra.mxu1 %v898_v10  ;;  %1604 = vmatprep.mubr.msk.bf16.mxu1 %vm1693_vm0, %v1691_v5  ;;  %v1012_v15 = vpop.permute.xlu1 %1011 }
  0xb4   : > { %v1015_v14 = vsel %vm1013_vm8, %v1008_v11, %v1010_v12  ;;  %1608 = vmatprep.subr.bf16.mxu1 %v1691_v5  ;;  %v1016_v16 = vsel %vm1013_vm8, %v1010_v12, %v1012_v15 }
  0xb5   : > { %1540 = vmatprep.subr.msk.bf16.mxu0 %vm267_vm2, %v1015_v14  ;;  %v1027_v20 = vsel %vm267_vm2, %v1016_v16, 0 }
  0xb7   : > { %v1135_v19 = vpop.permute.xlu0 %1134  ;;  %v1137_v21 = vpop.permute.xlu1 %1136 }
  0xb8   : > { %v1143_v23 = vsel %vm1142_vm9, %v1135_v19, %v1137_v21 }
  0xb9   : > { %1537 = vmatmul.mubr.msk.bf16.vlgmr.msra.gmra.mxu0 %vm263_vm3, %v1535_v17  ;;  %1605 = vmatmul.mubr.msk.bf16.vlgmr.msra.gmra.mxu1 %vm263_vm3, %v1535_v17  ;;  %v1150_v28 = vsel %vm267_vm2, %v1143_v23, 0 }
  0xba   : > { %1044 = vmatpush1.bf16.msra.mxu0 %v1021_v18  ;;  %1061 = vmatprep.mubr.bf16.mxu0 %v1692_v6 }
  0xbb   : > { %v1139_v22 = vpop.permute.xlu0 %1138  ;;  %1609 = vmatpush3.bf16.msra.mxu1 %v1027_v20  ;;  %1610 = vmatprep.mubr.msk.bf16.mxu1 %vm1693_vm0, %v1691_v5  ;;  %v1141_v25 = vpop.permute.xlu1 %1140 }
  0xbc   : > { %v1144_v24 = vsel %vm1142_vm9, %v1137_v21, %v1139_v22  ;;  %1614 = vmatprep.subr.bf16.mxu1 %v1691_v5  ;;  %v1145_v26 = vsel %vm1142_vm9, %v1139_v22, %v1141_v25 }
  0xbd   : > { %1544 = vmatprep.subr.msk.bf16.mxu0 %vm267_vm2, %v1144_v24  ;;  %v1156_v30 = vsel %vm267_vm2, %v1145_v26, 0 }
  0xbf   : > { %v1264_v29 = vpop.permute.xlu0 %1263  ;;  %v1266_v31 = vpop.permute.xlu1 %1265 }
  0xc0   : > { %v1272_v33 = vsel %vm1271_vm10, %v1264_v29, %v1266_v31 }
  0xc1   : > { %1541 = vmatmul.mubr.msk.bf16.vlgmr.msra.gmra.mxu0 %vm263_vm3, %v1539_v27  ;;  %1611 = vmatmul.mubr.msk.bf16.vlgmr.msra.gmra.mxu1 %vm263_vm3, %v1539_v27  ;;  %v1279_v38 = vsel %vm267_vm2, %v1272_v33, 0 }
  0xc2   : > { %1173 = vmatpush1.bf16.msra.mxu0 %v1150_v28  ;;  %1190 = vmatprep.mubr.bf16.mxu0 %v1692_v6 }
  0xc3   : > { %v1268_v32 = vpop.permute.xlu0 %1267  ;;  %1615 = vmatpush3.bf16.msra.mxu1 %v1156_v30  ;;  %1616 = vmatprep.mubr.msk.bf16.mxu1 %vm1693_vm0, %v1691_v5  ;;  %v1270_v35 = vpop.permute.xlu1 %1269 }
  0xc4   : > { %v1273_v34 = vsel %vm1271_vm10, %v1266_v31, %v1268_v32  ;;  %1620 = vmatprep.subr.bf16.mxu1 %v1691_v5  ;;  %v1274_v36 = vsel %vm1271_vm10, %v1268_v32, %v1270_v35 }
  0xc5   : > { %1548 = vmatprep.subr.msk.bf16.mxu0 %vm267_vm2, %v1273_v34  ;;  %v1285_v39 = vsel %vm267_vm2, %v1274_v36, 0 }
  0xc9   : > { %1545 = vmatmul.mubr.msk.bf16.vlgmr.msra.gmra.mxu0 %vm263_vm3, %v1543_v37  ;;  %1617 = vmatmul.mubr.msk.bf16.vlgmr.msra.gmra.mxu1 %vm263_vm3, %v1543_v37 }
  0xca   : > { %1302 = vmatpush1.bf16.msra.mxu0 %v1279_v38  ;;  %1319 = vmatprep.mubr.bf16.mxu0 %v1692_v6 }
  0xcb   : > { %1621 = vmatpush3.bf16.msra.mxu1 %v1285_v39  ;;  %1622 = vmatprep.mubr.msk.bf16.mxu1 %vm1693_vm0, %v1691_v5 }
  0xd1   : > { %1549 = vmatmul.mubr.msk.bf16.vlgmr.msra.gmra.mxu0 %vm263_vm3, %v1547_v40  ;;  %1623 = vmatmul.mubr.msk.bf16.vlgmr.msra.gmra.mxu1 %vm263_vm3, %v1547_v40 }
 0x151   : > { %v311_v41 = vpop.f32.mrf.mxu0  ;;  %v352_v43 = vpop.f32.mrf.mxu1 }
 0x153   : > { %v313_v42 = vpop.f32.mrf.mxu0  ;;  %v1576_v45 = vpop.f32.mrf.mxu1 }
 0x155   : > { %v315_v44 = vpop.f32.mrf.mxu0  ;;  %v355_v46 = vpop.f32.mrf.mxu1 }
 0x157   : > { %v316_v6 = vpop.f32.mrf.mxu0  ;;  %v1577_v47 = vpop.f32.mrf.mxu1 }
 0x159   : > { %v421_v48 = vpop.f32.mrf.mxu0  ;;  %v462_v50 = vpop.f32.mrf.mxu1 }
 0x15a   : > { %v422_v28 = vadd.f32 %v421_v48, %v311_v41  ;;  %v463_v32 = vadd.f32 %v462_v50, %v352_v43 }
 0x15b   : > { %v423_v49 = vpop.f32.mrf.mxu0  ;;  %v1582_v51 = vpop.f32.mrf.mxu1 }
 0x15c   : > { %v424_v31 = vadd.f32 %v423_v49, %v313_v42 }
 0x15d   : > { %v425_v5 = vpop.f32.mrf.mxu0  ;;  %v465_v53 = vpop.f32.mrf.mxu1 }
 0x15f   : > { %v426_v52 = vpop.f32.mrf.mxu0  ;;  %v1583_v54 = vpop.f32.mrf.mxu1 }
 0x161   : > { %v547_v55 = vpop.f32.mrf.mxu0  ;;  %v588_v57 = vpop.f32.mrf.mxu1 }
 0x162   : > { %v594_v33 = vadd.f32 %v547_v55, %v422_v28  ;;  %v596_v37 = vadd.f32 %v588_v57, %v463_v32  ;;  %v1375_v57 = vpop.permute.xlu0 %1374 }
 0x163   : > { %v549_v56 = vpop.f32.mrf.mxu0  ;;  %v1588_v59 = vpop.f32.mrf.mxu1 }
 0x164   : > { %v595_v36 = vadd.f32 %v549_v56, %v424_v31 }
 0x165   : > { %v551_v58 = vpop.f32.mrf.mxu0  ;;  %v591_v61 = vpop.f32.mrf.mxu1 }
 0x167   : > { %v552_v60 = vpop.f32.mrf.mxu0  ;;  %v1589_v62 = vpop.f32.mrf.mxu1 }
 0x169   : > { %v676_v63 = vpop.f32.mrf.mxu0  ;;  %v717_v1 = vpop.f32.mrf.mxu1 }
 0x16a   : > { %v723_v38 = vadd.f32 %v676_v63, %v594_v33  ;;  %v725_v45 = vadd.f32 %v717_v1, %v596_v37 }
 0x16b   : > { %v678_v0 = vpop.f32.mrf.mxu0  ;;  %v1594_v3 = vpop.f32.mrf.mxu1 }
 0x16c   : > { %v724_v44 = vadd.f32 %v678_v0, %v595_v36 }
 0x16d   : > { %v680_v2 = vpop.f32.mrf.mxu0  ;;  %v720_v7 = vpop.f32.mrf.mxu1 }
 0x16f   : > { %v681_v4 = vpop.f32.mrf.mxu0  ;;  %v1595_v8 = vpop.f32.mrf.mxu1 }
 0x171   : > { %v805_v9 = vpop.f32.mrf.mxu0  ;;  %v846_v11 = vpop.f32.mrf.mxu1 }
 0x172   : > { %v852_v6 = vadd.f32 %v805_v9, %v723_v38  ;;  %v854_v51 = vadd.f32 %v846_v11, %v725_v45 }
 0x173   : > { %v807_v10 = vpop.f32.mrf.mxu0  ;;  %v1600_v13 = vpop.f32.mrf.mxu1 }
 0x174   : > { %v853_v5 = vadd.f32 %v807_v10, %v724_v44 }
 0x175   : > { %v809_v12 = vpop.f32.mrf.mxu0  ;;  %v849_v15 = vpop.f32.mrf.mxu1 }
 0x177   : > { %v810_v14 = vpop.f32.mrf.mxu0  ;;  %v1601_v16 = vpop.f32.mrf.mxu1 }
 0x179   : > { %v934_v17 = vpop.f32.mrf.mxu0  ;;  %v975_v19 = vpop.f32.mrf.mxu1 }
 0x17a   : > { %v981_v41 = vadd.f32 %v934_v17, %v852_v6  ;;  %v983_v49 = vadd.f32 %v975_v19, %v854_v51 }
 0x17b   : > { %v936_v18 = vpop.f32.mrf.mxu0  ;;  %v1606_v21 = vpop.f32.mrf.mxu1 }
 0x17c   : > { %v982_v43 = vadd.f32 %v936_v18, %v853_v5 }
 0x17d   : > { %v938_v20 = vpop.f32.mrf.mxu0  ;;  %v978_v23 = vpop.f32.mrf.mxu1 }
 0x17f   : > { %v939_v22 = vpop.f32.mrf.mxu0  ;;  %v1607_v24 = vpop.f32.mrf.mxu1 }
 0x181   : > { %v1063_v25 = vpop.f32.mrf.mxu0  ;;  %v1104_v27 = vpop.f32.mrf.mxu1 }
 0x182   : > { %v1110_v50 = vadd.f32 %v1063_v25, %v981_v41  ;;  %v1112_v55 = vadd.f32 %v1104_v27, %v983_v49 }
 0x183   : > { %v1065_v26 = vpop.f32.mrf.mxu0  ;;  %v1612_v30 = vpop.f32.mrf.mxu1 }
 0x184   : > { %v1111_v54 = vadd.f32 %v1065_v26, %v982_v43 }
 0x185   : > { %v1067_v29 = vpop.f32.mrf.mxu0  ;;  %v1107_v35 = vpop.f32.mrf.mxu1 }
 0x187   : > { %v1068_v34 = vpop.f32.mrf.mxu0  ;;  %v1613_v39 = vpop.f32.mrf.mxu1 }
 0x189   : > { %v1192_v40 = vpop.f32.mrf.mxu0  ;;  %v1233_v47 = vpop.f32.mrf.mxu1 }
 0x18a   : > { %v1239_v56 = vadd.f32 %v1192_v40, %v1110_v50  ;;  %v1241_v61 = vadd.f32 %v1233_v47, %v1112_v55 }
 0x18b   : > { %v1194_v46 = vpop.f32.mrf.mxu0  ;;  %v1618_v42 = vpop.f32.mrf.mxu1 }
 0x18c   : > { %v1240_v60 = vadd.f32 %v1194_v46, %v1111_v54 }
 0x18d   : > { %v1196_v48 = vpop.f32.mrf.mxu0  ;;  %v1236_v53 = vpop.f32.mrf.mxu1 }
 0x18f   : > { %v1197_v52 = vpop.f32.mrf.mxu0  ;;  %v1619_v58 = vpop.f32.mrf.mxu1 }
 0x191   : > { %v1321_v59 = vpop.f32.mrf.mxu0  ;;  %v1362_v0 = vpop.f32.mrf.mxu1 }
 0x192   : > { %v1368_v62 = vadd.f32 %v1321_v59, %v1239_v56  ;;  %v1370_v3 = vadd.f32 %v1362_v0, %v1241_v61 }
 0x193   : > { %v1323_v63 = vpop.f32.mrf.mxu0  ;;  %v1624_v7 = vpop.f32.mrf.mxu1 }
 0x194   : > { %v1377_v1 = vadd.f32 %v1375_v57, %v1368_v62  ;;  %v1369_v2 = vadd.f32 %v1323_v63, %v1240_v60  ;;  %v1379_v10 = vadd.f32 %v1375_v57, %v1370_v3 }
 0x195   : > { %v1325_v4 = vpop.f32.mrf.mxu0  ;;  %v1365_v12 = vpop.f32.mrf.mxu1 }
 0x196   : > { %vm1380_vm11 = vcmp.gt.f32.partialorder %v1377_v1, 0.0  ;;  %v1383_v8 = vmul.f32 0.1, %v1377_v1  ;;  %v1378_v9 = vadd.f32 %v1375_v57, %v1369_v2  ;;  %vm1382_vm13 = vcmp.gt.f32.partialorder %v1379_v10, 0.0 }
 0x197   : > { %v1326_v11 = vpop.f32.mrf.mxu0  ;;  %v1385_v15 = vmul.f32 0.1, %v1379_v10  ;;  %v1625_v16 = vpop.f32.mrf.mxu1 }
 0x198   : > { %v1386_v13 = vsel %vm1380_vm11, %v1377_v1, %v1383_v8  ;;  %vm1381_vm12 = vcmp.gt.f32.partialorder %v1378_v9, 0.0  ;;  %v1384_v14 = vmul.f32 0.1, %v1378_v9 }
 0x199   : > { %1389 = vst [vmem:[%s226_s28] sm:$0xff] %v1386_v13  ;;  %v1388_v18 = vsel %vm1382_vm13, %v1379_v10, %v1385_v15 }
 0x19a   : > { %v1387_v17 = vsel %vm1381_vm12, %v1378_v9, %v1384_v14  ;;  %1391 = vst [vmem:[%s226_s28 + $0x10] sm:$0xff] %v1388_v18 }
 0x19b   : > { %1390 = vst [vmem:[%s226_s28 + $0x8] sm:$0xff] %v1387_v17 }
 0x19c PF: > { %s13_s14 = sadd.s32 1, %s1688_s14   ;;  %s1883_s12 = smov %s1684_s13 }
 0x19d   : > { %p10_p5 = scmp.ge.s32.totalorder %s13_s14, 4   ;;  %s1884_s13 = smov %s1886_s15 }
 0x19f   :  { %12 = sbr.rel (!%p10_p5) target bundleno = 2 (0x2), region = 76 }

</bundles_post_ra>
